<compile_context>
chip_gen: v6e
topology: v6e:2x2x1
jax: 0.10.0
libtpu: 0.0.40
codegen_flags: <defaults>
</compile_context>

<pallas_src>
import jax
import jax.numpy as jnp
from jax.experimental import pallas as pl
from jax.experimental.pallas import tpu as pltpu


# -----------------------------------------------------------------------------
# forward(): identity on the learned parameter -> zero-data-movement kernel.
# -----------------------------------------------------------------------------
def _pos_embed_alias_kernel(pos_hbm_ref, out_hbm_ref):
    # Output HBM buffer aliases the parameter HBM buffer
    # (input_output_aliases={0: 0} below), so the learned positional embedding
    # is already sitting in the output: no DMA, no VMEM staging, no compute.
    del pos_hbm_ref, out_hbm_ref


def learned_positional_embedding_forward(pos_embed: jax.Array) -> jax.Array:
    """Pallas equivalent of LearnedPositionalEmbedding.forward().

    forward() just returns the parameter, so the optimal kernel is a
    zero-byte HBM-aliased identity (vs. 2x the parameter size in HBM traffic
    for a copy kernel).  For real models, prefer fusing the parameter into
    its consumer — see `add_positional_embedding`.
    """
    one, num_patches, embed_dim = pos_embed.shape
    assert one == 1
    return pl.pallas_call(
        _pos_embed_alias_kernel,
        out_shape=jax.ShapeDtypeStruct((1, num_patches, embed_dim), pos_embed.dtype),
        in_specs=[pl.BlockSpec(memory_space=pl.ANY)],   # raw HBM ref, no auto-DMA
        out_specs=pl.BlockSpec(memory_space=pl.ANY),    # raw HBM ref, aliased
        input_output_aliases={0: 0},                    # output IS the parameter buffer
    )(pos_embed)


# -----------------------------------------------------------------------------
# Recommended use-site: fuse (tokens + pos_embed) into one tiled kernel.
# -----------------------------------------------------------------------------
def _add_pos_embed_kernel(tok_ref, pos_ref, out_ref):
    # Refs are (tile_p, embed_dim); the batch dim is squeezed out of the tiles.
    out_ref[...] = (tok_ref[...] + pos_ref[...]).astype(out_ref.dtype)


def add_positional_embedding(
    tokens: jax.Array, pos_embed: jax.Array, *, patch_tile: int = 512
) -> jax.Array:
    """tokens: (B, num_patches, embed_dim); pos_embed: (1, num_patches, embed_dim).

    Tiles over num_patches (sublane axis, multiple of 8) and keeps the full,
    lane-dense embed_dim as the last block dim so stores are unmasked vst's.
    patch_tile=512 keeps double-buffered (2x) tokens/pos/out tiles well under
    the scoped-VMEM default and v7x's 64 MiB physical VMEM even for
    embed_dim=4096 bf16.
    """
    batch, num_patches, embed_dim = tokens.shape
    assert pos_embed.shape == (1, num_patches, embed_dim)

    if num_patches <= patch_tile:
        tile_p = num_patches             # full dim -> (8,128) constraint waived
    else:
        tile_p = (patch_tile // 8) * 8   # sublane tile must be a multiple of 8

    grid = (batch, pl.cdiv(num_patches, tile_p))

    return pl.pallas_call(
        _add_pos_embed_kernel,
        out_shape=jax.ShapeDtypeStruct(tokens.shape, tokens.dtype),
        grid_spec=pltpu.PrefetchScalarGridSpec(
            num_scalar_prefetch=0,
            grid=grid,
            in_specs=[
                # Leading None squeezes the per-step batch dim out of the refs.
                pl.BlockSpec((None, tile_p, embed_dim), lambda b, p: (b, p, 0)),
                pl.BlockSpec((None, tile_p, embed_dim), lambda b, p: (0, p, 0)),
            ],
            out_specs=pl.BlockSpec((None, tile_p, embed_dim), lambda b, p: (b, p, 0)),
        ),
        # Both grid axes are independent -> "parallel" (lets v7x's two
        # TensorCores split the add; harmless on single-TC v5e/v6e).
        compiler_params=pltpu.CompilerParams(
            dimension_semantics=("parallel", "parallel"),
        ),
    )(tokens, pos_embed)


# -----------------------------------------------------------------------------
# Parameter init matching nn.init.trunc_normal_(pos_embed, std=0.02).
# -----------------------------------------------------------------------------
def init_pos_embed(key, num_patches, embed_dim, *, std=0.02, mean=0.0,
                   a=-2.0, b=2.0, dtype=jnp.float32):
    """PyTorch trunc_normal_ truncates N(mean, std) at ABSOLUTE bounds [a, b]
    (with std=0.02 that is +/-100 sigma, i.e. effectively no truncation)."""
    lower = (a - mean) / std
    upper = (b - mean) / std
    z = jax.random.truncated_normal(
        key, lower=lower, upper=upper, shape=(1, num_patches, embed_dim),
        dtype=jnp.float32,
    )
    return (mean + std * z).astype(dtype)


if __name__ == "__main__":
    num_patches = 16
    embed_dim = 128   # lane axis kept a multiple of 128
    batch = 2

    key = jax.random.PRNGKey(0)
    k_pos, k_tok = jax.random.split(key)
    pos_embed = init_pos_embed(k_pos, num_patches, embed_dim)

    # forward(): zero-data-movement aliased kernel.
    out = jax.block_until_ready(learned_positional_embedding_forward(pos_embed))
    assert out.shape == (1, num_patches, embed_dim)
    assert out.dtype == pos_embed.dtype
    assert bool(jnp.array_equal(out, pos_embed))

    # Recommended fused use-site: tokens + pos_embed in one tiled kernel.
    tokens = jax.random.normal(k_tok, (batch, num_patches, embed_dim), jnp.float32)
    fused = jax.block_until_ready(add_positional_embedding(tokens, pos_embed))
    assert fused.shape == tokens.shape
    assert bool(jnp.allclose(fused, tokens + pos_embed, rtol=0.0, atol=1e-6))

    print("KERNEL_OK")
</pallas_src>

<mosaic_0001>
module attributes {stable_mosaic.version = 11 : i64} {
  func.func @_pos_embed_alias_kernel(%arg0: memref<1x16x128xf32, #tpu.memory_space<any>>, %arg1: memref<1x16x128xf32, #tpu.memory_space<any>>) attributes {dimension_semantics = [], scalar_prefetch = 0 : i64, scratch_operands = 0 : i64, tpu.core_type = #tpu.core_type<tc>} {
    return
  }
}

</mosaic_0001>

<bundles_post_ra>
// kernel: tpu_custom_call.1
= control target key start
LH: loop header
LB: loop body
LE: loop exit
PB: predicated region body
PF: predicated region fallthrough
CT: control target
= control target key end

     0   :  { %s16_s0 = inlined_call_operand.hbm [shape: f32[1,16,128], index: 0, kind: input, shape index: {}, may-alias: {0,1}]   ;;  %s17_s1 = inlined_call_operand.hbm [shape: f32[1,16,128], index: 1, kind: output, shape index: {}, may-alias: {0,1}]  }

</bundles_post_ra>
